<compile_context>
chip_gen: v6e
topology: v6e:2x2x1
jax: 0.10.0
libtpu: 0.0.40
codegen_flags: <defaults>
</compile_context>

<pallas_src>
import jax
import jax.numpy as jnp
from jax import lax
from jax.experimental import pallas as pl
from jax.experimental.pallas import tpu as pltpu  # noqa: F401  (TPU backend)


def _predictor_kernel(x_ref, w_ref, b_ref, o_ref):
    """out[B, N_pad] = x[B, F] · w[F, N_pad] + b[1, N_pad].

    x and w are bf16 (lane-dense, contraction axis F is a multiple of 128);
    the matmul runs on the MXU with a float32 accumulator; the bias add is f32.
    """
    acc = lax.dot_general(
        x_ref[...], w_ref[...],
        dimension_numbers=(((1,), (0,)), ((), ())),   # canonical: x·W, no transpose
        preferred_element_type=jnp.float32,
    )
    o_ref[...] = acc + b_ref[...]


def make_cafo_predictor(weight, bias):
    """Builds a jitted forward equivalent to CaFoPredictor.forward.

    One-time parameter prep (cached across calls):
      * weight (N, F) f32  ->  bf16, transposed to (F, N_pad), zero-padded so
        the output block is a full 128-lane width (unmasked stores).
      * bias (N,) f32      ->  (1, N_pad) f32 broadcast row.

    Args:
      weight: (num_classes, in_features) float32 — torch fc.weight layout.
      bias:   (num_classes,) float32.

    Returns:
      predict(x_nchw) -> (B, num_classes) float32 logits.
    """
    N, F = int(weight.shape[0]), int(weight.shape[1])
    N_pad = ((N + 127) // 128) * 128

    # --- hoisted, done once ---------------------------------------------
    w_t_pad = jnp.zeros((F, N_pad), dtype=jnp.bfloat16)
    w_t_pad = w_t_pad.at[:, :N].set(weight.astype(jnp.bfloat16).T)
    b_pad = jnp.zeros((1, N_pad), dtype=jnp.float32)
    b_pad = b_pad.at[0, :N].set(bias.astype(jnp.float32))
    w_t_pad = jax.device_put(w_t_pad)
    b_pad = jax.device_put(b_pad)
    # ----------------------------------------------------------------------

    def _forward(x_nchw, w_t_pad, b_pad):
        B = x_nchw.shape[0]
        # nn.Flatten on NCHW (row-major) + bf16 cast for the MXU input.
        x_flat = x_nchw.reshape(B, F).astype(jnp.bfloat16)
        out_pad = pl.pallas_call(
            _predictor_kernel,
            out_shape=jax.ShapeDtypeStruct((B, N_pad), jnp.float32),
        )(x_flat, w_t_pad, b_pad)
        return out_pad[:, :N]

    forward = jax.jit(_forward)

    def predict(x_nchw):
        return forward(x_nchw, w_t_pad, b_pad)

    return predict


if __name__ == "__main__":
    # Small shapes consistent with a CaFoBlock output: B=2, C=4, H=W=16.
    # (B=2 keeps the demo small; the kernel handles any B — larger B is
    #  essentially free throughput since the weight DMA dominates.)
    B, C, H, W = 2, 4, 16, 16
    in_features = C * H * W          # 1024
    num_classes = 10

    key = jax.random.PRNGKey(0)
    kx, kw, kb = jax.random.split(key, 3)

    x = jax.random.normal(kx, (B, C, H, W), dtype=jnp.float32)

    # Deterministic param init mimicking torch.nn.Linear: U(-1/sqrt(F), 1/sqrt(F)).
    bound = 1.0 / (in_features ** 0.5)
    weight = jax.random.uniform(
        kw, (num_classes, in_features), minval=-bound, maxval=bound,
        dtype=jnp.float32)
    bias = jax.random.uniform(
        kb, (num_classes,), minval=-bound, maxval=bound, dtype=jnp.float32)

    predict = make_cafo_predictor(weight, bias)

    out = predict(x)                 # compiles once (jit) ...
    out = predict(x)                 # ... cached params + compiled program reused
    out = jax.block_until_ready(out)
    assert out.shape == (B, num_classes)

    # Tight check against a reference using the same bf16-cast inputs
    # (isolates kernel correctness from the intentional bf16 quantization).
    x_bf = x.reshape(B, -1).astype(jnp.bfloat16).astype(jnp.float32)
    w_bf = weight.astype(jnp.bfloat16).astype(jnp.float32)
    ref_bf = x_bf @ w_bf.T + bias
    assert jnp.allclose(out, ref_bf, atol=1e-3, rtol=1e-3)

    # Loose check against the full-f32 PyTorch-equivalent math (bf16 input loss).
    ref_f32 = x.reshape(B, -1) @ weight.T + bias
    assert jnp.allclose(out, ref_f32, atol=5e-2, rtol=5e-2)

    print("KERNEL_OK")
</pallas_src>

<mosaic_0001>
module attributes {stable_mosaic.version = 11 : i64} {
  func.func @_predictor_kernel(%arg0: memref<2x1024xbf16, #tpu.memory_space<vmem>>, %arg1: memref<1024x128xbf16, #tpu.memory_space<vmem>>, %arg2: memref<1x128xf32, #tpu.memory_space<vmem>>, %arg3: memref<2x128xf32, #tpu.memory_space<vmem>>) attributes {dimension_semantics = [], scalar_prefetch = 0 : i64, scratch_operands = 0 : i64, tpu.core_type = #tpu.core_type<tc>} {
    %c0 = arith.constant 0 : index
    %c0_0 = arith.constant 0 : index
    %0 = vector.load %arg0[%c0, %c0_0] : memref<2x1024xbf16, #tpu.memory_space<vmem>>, vector<2x1024xbf16>
    %c0_1 = arith.constant 0 : index
    %c0_2 = arith.constant 0 : index
    %1 = vector.load %arg1[%c0_1, %c0_2] : memref<1024x128xbf16, #tpu.memory_space<vmem>>, vector<1024x128xbf16>
    %cst = arith.constant dense<0.000000e+00> : vector<2x128xf32>
    %2 = tpu.matmul %0, %1, %cst {dimension_numbers = #tpu.dot_dimension_numbers<[1], [0], [0], [1], [0, 0, 1, 1], [], []>} : vector<2x1024xbf16>, vector<1024x128xbf16>, vector<2x128xf32> -> vector<2x128xf32>
    %c0_3 = arith.constant 0 : index
    %c0_4 = arith.constant 0 : index
    %3 = vector.load %arg2[%c0_3, %c0_4] : memref<1x128xf32, #tpu.memory_space<vmem>>, vector<1x128xf32>
    %4 = vector.broadcast %3 : vector<1x128xf32> to vector<2x128xf32>
    %5 = arith.addf %2, %4 : vector<2x128xf32>
    %c0_5 = arith.constant 0 : index
    %c0_6 = arith.constant 0 : index
    %6 = vector.load %arg3[%c0_5, %c0_6] : memref<2x128xf32, #tpu.memory_space<vmem>>, vector<2x128xf32>
    tpu.vector_store %arg3[%c0_5, %c0_6], %5 {strides = array<i32>} : memref<2x128xf32, #tpu.memory_space<vmem>>, vector<2x128xf32>,
    return
  }
}

</mosaic_0001>

<bundles_post_ra>
// kernel: _forward.1
= control target key start
LH: loop header
LB: loop body
LE: loop exit
PB: predicated region body
PF: predicated region fallthrough
CT: control target
= control target key end

     0   :  { %8 = vsyncpa [#allocation3], 0  ;;  %s1101_s0 = inlined_call_operand.vmem [shape: bf16[2,1024], index: 0, kind: input, shape index: {}]   ;;  %s1102_s1 = inlined_call_operand.hbm [shape: bf16[1024,128], index: 1, kind: input, shape index: {}]   ;;  %s1103_s2 = inlined_call_operand.vmem [shape: f32[1,128], index: 2, kind: input, shape index: {}]   ;;  %s1104_s3 = inlined_call_operand.hbm [shape: f32[2,128], index: 3, kind: output, shape index: {}]  }
   0x1   :  { %9 = vsyncpa [#allocation4], 0  ;;  %s1051_s12 = smov [#allocation2]  }
   0x2   :  { %s17_s13 = sshll.u32 %s1051_s12, 4  ;;  %s18_s13 = int_to_ptr.vmem [resolvable:$true] %s17_s13 }
   0x3   :  { %s1015_s14 = scalar_lea.vmem %s18_s13, 8192  ;;  %p1020_p1 = scmp.lt.s32.totalorder %s18_s13, %s18_s13 }
   0x4   :  { %p1016_p0 = scmp.ne.s32.totalorder %s18_s13, %s1015_s14  ;;  %p1021_p2 = scmp.lt.s32.totalorder %s1015_s14, %s1015_s14 }
   0x6   :  { %p1022_p3 = por %p1021_p2, %p1020_p1 }
   0x8   :  { %p1023_p4 = pnand %p1022_p3, %p1016_p0 }
   0xa   :  { %1026 = shalt.err (!%p1023_p4)
}
   0xb   :  { %s1052_s15 = smov 64   ;;  %s1053_s16 = smov 4  }
   0xc   :  { %23 = dma.hbm_to_vmem [thread:$0]  %s1102_s1, 8192, %s18_s13, [#allocation3], %s1052_s15, %s1052_s15, %s1053_s16  }
   0xd   :  { %1047 = dma.done.wait [#allocation3], 8192  }
   0xe   :  { %1048 = vsyncadd [#allocation3], 4294959104  ;;  %v942_v0 = vld [vmem:[#allocation2 + $0x78] sm:$0xff]   ;;  %v946_v4 = vld [vmem:[#allocation2 + $0x70] sm:$0xff]   ;;  %v1054_v22 = vmov 1966171168   ;;  %v171_v24 = vlaneseq }
   0xf   :  { %v943_v1 = vld [vmem:[#allocation2 + $0xf8] sm:$0xff]   ;;  %849 = vmatprep.subr.bf16.mxu0 %v942_v0  ;;  %v947_v5 = vld [vmem:[#allocation2 + $0xf0] sm:$0xff]   ;;  %v950_v8 = vld [vmem:[#allocation2 + $0x68] sm:$0xff]   ;;  %v169_v23 = vunpack.c.l.s4 %v1054_v22  ;;  %s1055_s21 = smov [#allocation5]  }
  0x10   :  { %v944_v2 = vld [vmem:[#allocation2 + $0x38] sm:$0xff]   ;;  %871 = vmatprep.subr.bf16.mxu1 %v943_v1  ;;  %v948_v6 = vld [vmem:[#allocation2 + $0x30] sm:$0xff]   ;;  %v951_v9 = vld [vmem:[#allocation2 + $0xe8] sm:$0xff]   ;;  %v172_v30 = vshrl.u32 %v171_v24, 7  ;;  %s775_s22 = sshll.u32 %s1055_s21, 4  ;;  %s776_s22 = int_to_ptr.vmem [resolvable:$true] %s775_s22 }
  0x11   :  { %v945_v3 = vld [vmem:[#allocation2 + $0xb8] sm:$0xff]   ;;  %850 = vmatpush3.bf16.msra.mxu0 %v944_v2  ;;  %v949_v7 = vld [vmem:[#allocation2 + $0xb0] sm:$0xff]   ;;  %v952_v10 = vld [vmem:[#allocation2 + $0x28] sm:$0xff]   ;;  %v170_v29 = vunpack.c.0.s8 %v169_v23  ;;  %p1032_p6 = scmp.lt.s32.totalorder %s776_s22, %s776_s22 }
  0x12   :  { %872 = vmatpush3.bf16.msra.mxu1 %v945_v3  ;;  %851 = vmatprep.subr.bf16.mxu0 %v946_v4  ;;  %v953_v11 = vld [vmem:[#allocation2 + $0xa8] sm:$0xff]   ;;  %v954_v12 = vld [vmem:[#allocation2 + $0x60] sm:$0xff]   ;;  %v958_v16 = vld [vmem:[#allocation2 + $0x58] sm:$0xff]  }
  0x13   :  { %873 = vmatprep.subr.bf16.mxu1 %v947_v5  ;;  %v955_v13 = vld [vmem:[#allocation2 + $0xe0] sm:$0xff]   ;;  %v959_v17 = vld [vmem:[#allocation2 + $0xd8] sm:$0xff]   ;;  %v962_v20 = vld [vmem:[#allocation2 + $0x50] sm:$0xff]   ;;  %v1079_v35 = vsub.s32 %v170_v29, %v172_v30 }
  0x14   :  { %v956_v14 = vld [vmem:[#allocation2 + $0x20] sm:$0xff]   ;;  %v960_v18 = vld [vmem:[#allocation2 + $0x18] sm:$0xff]   ;;  %v963_v21 = vld [vmem:[#allocation2 + $0xd0] sm:$0xff]  }
  0x15   :  { %852 = vmatpush3.bf16.msra.mxu0 %v948_v6  ;;  %v957_v15 = vld [vmem:[#allocation2 + $0xa0] sm:$0xff]   ;;  %v961_v19 = vld [vmem:[#allocation2 + $0x98] sm:$0xff]   ;;  %v964_v25 = vld [vmem:[#allocation2 + $0x10] sm:$0xff]  }
  0x16   :  { %874 = vmatpush3.bf16.msra.mxu1 %v949_v7  ;;  %853 = vmatprep.subr.bf16.mxu0 %v950_v8  ;;  %v965_v26 = vld [vmem:[#allocation2 + $0x90] sm:$0xff]   ;;  %v966_v27 = vld [vmem:[#allocation2 + $0x48] sm:$0xff]   ;;  %v970_v33 = vld [vmem:[#allocation2 + $0x40] sm:$0xff]  }
  0x17   :  { %875 = vmatprep.subr.bf16.mxu1 %v951_v9  ;;  %v967_v28 = vld [vmem:[#allocation2 + $0xc8] sm:$0xff]   ;;  %v971_v34 = vld [vmem:[#allocation2 + $0xc0] sm:$0xff]   ;;  %v975_v41 = vld [vmem:[#allocation2 + $0x178] sm:$0xff]  }
  0x18   :  { %v968_v31 = vld [vmem:[#allocation2 + $0x8] sm:$0xff]   ;;  %v972_v36 = vld [vmem:[#allocation2] sm:$0xff]   ;;  %v976_v42 = vld [vmem:[#allocation2 + $0x1f8] sm:$0xff]  }
  0x19   :  { %854 = vmatpush3.bf16.msra.mxu0 %v952_v10  ;;  %v969_v32 = vld [vmem:[#allocation2 + $0x88] sm:$0xff]   ;;  %v973_v37 = vld [vmem:[#allocation2 + $0x80] sm:$0xff]   ;;  %v977_v47 = vld [vmem:[#allocation2 + $0x138] sm:$0xff]  }
  0x1a   :  { %876 = vmatpush3.bf16.msra.mxu1 %v953_v11  ;;  %855 = vmatprep.subr.bf16.mxu0 %v954_v12  ;;  %v30_v38 = vld [vmem:[%s1101_s0] sm:$0xff]  ;;  %v979_v50 = vld [vmem:[#allocation2 + $0x170] sm:$0xff]   ;;  %v978_v52 = vld [vmem:[#allocation2 + $0x1b8] sm:$0xff]  }
  0x1b   :  { %877 = vmatprep.subr.bf16.mxu1 %v955_v13  ;;  %v167_v39 = vcombine.high %v30_v38, %v30_v38  ;;  %v174_v40 = vrot.slane %v30_v38, %v1079_v35  ;;  %v980_v54 = vld [vmem:[#allocation2 + $0x1f0] sm:$0xff]   ;;  %v983_v57 = vld [vmem:[#allocation2 + $0x168] sm:$0xff]   ;;  %v987_v61 = vld [vmem:[#allocation2 + $0x160] sm:$0xff]  }
  0x1c   :  { %v981_v55 = vld [vmem:[#allocation2 + $0x130] sm:$0xff]   ;;  %v984_v59 = vld [vmem:[#allocation2 + $0x1e8] sm:$0xff]   ;;  %v988_v63 = vld [vmem:[#allocation2 + $0x1e0] sm:$0xff]  }
  0x1d   :  { %856 = vmatpush3.bf16.msra.mxu0 %v956_v14  ;;  %v182_v43 = vcombine.high %v174_v40, %v174_v40  ;;  %v190_v44 = vrot.slane %v174_v40, %v1079_v35  ;;  %v1087_v45 = vrot.slane %v167_v39, %v1079_v35  ;;  %v982_v58 = vld [vmem:[#allocation2 + $0x1b0] sm:$0xff]   ;;  %v985_v60 = vld [vmem:[#allocation2 + $0x128] sm:$0xff]   ;;  %v989_v0 = vld [vmem:[#allocation2 + $0x120] sm:$0xff]  }
  0x1e   :  { %878 = vmatpush3.bf16.msra.mxu1 %v957_v15  ;;  %857 = vmatprep.subr.bf16.mxu0 %v958_v16  ;;  %v986_v62 = vld [vmem:[#allocation2 + $0x1a8] sm:$0xff]   ;;  %v991_v1 = vld [vmem:[#allocation2 + $0x158] sm:$0xff]   ;;  %v990_v2 = vld [vmem:[#allocation2 + $0x1a0] sm:$0xff]  }
  0x1f   :  { %879 = vmatprep.subr.bf16.mxu1 %v959_v17  ;;  %v204_v46 = vrot.slane %v182_v43, %v1079_v35  ;;  %v183_v48 = vcombine.high %v1087_v45, %v1087_v45  ;;  %v212_v49 = vcombine.high %v190_v44, %v190_v44  ;;  %v992_v3 = vld [vmem:[#allocation2 + $0x1d8] sm:$0xff]   ;;  %v995_v5 = vld [vmem:[#allocation2 + $0x150] sm:$0xff]   ;;  %v999_v9 = vld [vmem:[#allocation2 + $0x148] sm:$0xff]   ;;  %v197_v17 = vrot.slane %v1087_v45, %v1079_v35 }
  0x20   :  { %v993_v4 = vld [vmem:[#allocation2 + $0x118] sm:$0xff]   ;;  %v996_v7 = vld [vmem:[#allocation2 + $0x1d0] sm:$0xff]   ;;  %v1000_v11 = vld [vmem:[#allocation2 + $0x1c8] sm:$0xff]  }
  0x21   :  { %858 = vmatpush3.bf16.msra.mxu0 %v960_v18  ;;  %640 = vmatprep.mubr.bf16.mxu0 %v204_v46  ;;  %v214_v51 = vcombine.high %v204_v46, %v204_v46  ;;  %v211_v53 = vrot.slane %v183_v48, %v1079_v35  ;;  %v994_v6 = vld [vmem:[#allocation2 + $0x198] sm:$0xff]   ;;  %v997_v8 = vld [vmem:[#allocation2 + $0x110] sm:$0xff]   ;;  %v1001_v12 = vld [vmem:[#allocation2 + $0x108] sm:$0xff]  }
  0x22   :  { %880 = vmatpush3.bf16.msra.mxu1 %v961_v19  ;;  %859 = vmatprep.subr.bf16.mxu0 %v962_v20  ;;  %v998_v10 = vld [vmem:[#allocation2 + $0x190] sm:$0xff]   ;;  %v1003_v13 = vld [vmem:[#allocation2 + $0x140] sm:$0xff]   ;;  %v1002_v14 = vld [vmem:[#allocation2 + $0x188] sm:$0xff]   ;;  %v213_v19 = vcombine.high %v197_v17, %v197_v17 }
  0x23   :  { %881 = vmatprep.subr.bf16.mxu1 %v963_v21  ;;  %680 = vmatprep.mubr.bf16.mxu1 %v214_v51  ;;  %v215_v56 = vcombine.high %v211_v53, %v211_v53  ;;  %v1004_v15 = vld [vmem:[#allocation2 + $0x1c0] sm:$0xff]  }
  0x24   :  { %v1005_v16 = vld [vmem:[#allocation2 + $0x100] sm:$0xff]  }
  0x25   :  { %860 = vmatpush3.bf16.msra.mxu0 %v964_v25  ;;  %v1006_v18 = vld [vmem:[#allocation2 + $0x180] sm:$0xff]  }
  0x26   :  { %882 = vmatpush3.bf16.msra.mxu1 %v965_v26  ;;  %861 = vmatprep.subr.bf16.mxu0 %v966_v27  ;;  %v784_v29 = vld [vmem:[%s1103_s2] ss:$0 sm:$0xff]  ;;  %s1027_s2 = scalar_lea.vmem %s776_s22, 32 }
  0x27   :  { %883 = vmatprep.subr.bf16.mxu1 %v967_v28  ;;  %p1028_p5 = scmp.ne.s32.totalorder %s776_s22, %s1027_s2  ;;  %p1033_p7 = scmp.lt.s32.totalorder %s1027_s2, %s1027_s2 }
  0x29   :  { %862 = vmatpush3.bf16.msra.mxu0 %v968_v31  ;;  %p1034_p8 = por %p1033_p7, %p1032_p6 }
  0x2a   :  { %884 = vmatpush3.bf16.msra.mxu1 %v969_v32  ;;  %863 = vmatprep.subr.bf16.mxu0 %v970_v33 }
  0x2b   :  { %885 = vmatprep.subr.bf16.mxu1 %v971_v34  ;;  %p1035_p9 = pnand %p1034_p8, %p1028_p5 }
  0x2d   :  { %864 = vmatpush3.bf16.msra.mxu0 %v972_v36 }
  0x2e   :  { %886 = vmatpush3.bf16.msra.mxu1 %v973_v37  ;;  %893 = vmatprep.subr.bf16.mxu0 %v975_v41 }
  0x2f   :  { %915 = vmatprep.subr.bf16.mxu1 %v976_v42 }
  0x30   :  { %641 = vmatmul.mubr.bf16.vlgmr.msra.gmra.mxu0 %v190_v44 }
  0x31   :  { %894 = vmatpush3.bf16.msra.mxu0 %v977_v47  ;;  %681 = vmatmul.mubr.bf16.vlgmr.msra.gmra.mxu1 %v212_v49 }
  0x32   :  { %895 = vmatprep.subr.bf16.mxu0 %v979_v50  ;;  %916 = vmatpush3.bf16.msra.mxu1 %v978_v52 }
  0x33   :  { %720 = vmatprep.mubr.bf16.mxu0 %v211_v53  ;;  %917 = vmatprep.subr.bf16.mxu1 %v980_v54 }
  0x34   :  { %760 = vmatprep.mubr.bf16.mxu1 %v215_v56 }
  0x35   :  { %896 = vmatpush3.bf16.msra.mxu0 %v981_v55 }
  0x36   :  { %897 = vmatprep.subr.bf16.mxu0 %v983_v57  ;;  %918 = vmatpush3.bf16.msra.mxu1 %v982_v58 }
  0x37   :  { %919 = vmatprep.subr.bf16.mxu1 %v984_v59 }
  0x39   :  { %898 = vmatpush3.bf16.msra.mxu0 %v985_v60 }
  0x3a   :  { %899 = vmatprep.subr.bf16.mxu0 %v987_v61  ;;  %920 = vmatpush3.bf16.msra.mxu1 %v986_v62 }
  0x3b   :  { %921 = vmatprep.subr.bf16.mxu1 %v988_v63 }
  0x3d   :  { %900 = vmatpush3.bf16.msra.mxu0 %v989_v0 }
  0x3e   :  { %901 = vmatprep.subr.bf16.mxu0 %v991_v1  ;;  %922 = vmatpush3.bf16.msra.mxu1 %v990_v2 }
  0x3f   :  { %923 = vmatprep.subr.bf16.mxu1 %v992_v3 }
  0x41   :  { %902 = vmatpush3.bf16.msra.mxu0 %v993_v4 }
  0x42   :  { %903 = vmatprep.subr.bf16.mxu0 %v995_v5  ;;  %924 = vmatpush3.bf16.msra.mxu1 %v994_v6 }
  0x43   :  { %925 = vmatprep.subr.bf16.mxu1 %v996_v7 }
  0x45   :  { %904 = vmatpush3.bf16.msra.mxu0 %v997_v8 }
  0x46   :  { %905 = vmatprep.subr.bf16.mxu0 %v999_v9  ;;  %926 = vmatpush3.bf16.msra.mxu1 %v998_v10 }
  0x47   :  { %927 = vmatprep.subr.bf16.mxu1 %v1000_v11 }
  0x49   :  { %906 = vmatpush3.bf16.msra.mxu0 %v1001_v12 }
  0x4a   :  { %907 = vmatprep.subr.bf16.mxu0 %v1003_v13  ;;  %928 = vmatpush3.bf16.msra.mxu1 %v1002_v14 }
  0x4b   :  { %929 = vmatprep.subr.bf16.mxu1 %v1004_v15 }
  0x4d   :  { %908 = vmatpush3.bf16.msra.mxu0 %v1005_v16 }
  0x4e   :  { %930 = vmatpush3.bf16.msra.mxu1 %v1006_v18 }
  0x50   :  { %721 = vmatmul.mubr.bf16.vlgmr.msra.gmra.mxu0 %v197_v17 }
  0x51   :  { %761 = vmatmul.mubr.bf16.vlgmr.msra.gmra.mxu1 %v213_v19 }
  0xf0   :  { %v865_v20 = vpop.f32.mrf.mxu0 }
  0xf1   :  { %v887_v21 = vpop.f32.mrf.mxu1 }
  0xf2   :  { %v866_v22 = vpop.f32.mrf.mxu0 }
  0xf3   :  { %v888_v23 = vpop.f32.mrf.mxu1  ;;  %v867_v28 = vadd.f32 %v866_v22, %v865_v20 }
  0xf4   :  { %v868_v24 = vpop.f32.mrf.mxu0  ;;  %v889_v31 = vadd.f32 %v888_v23, %v887_v21 }
  0xf5   :  { %v890_v25 = vpop.f32.mrf.mxu1  ;;  %v643_v30 = vadd.f32 %v867_v28, %v784_v29 }
  0xf6   :  { %v869_v26 = vpop.f32.mrf.mxu0 }
  0xf7   :  { %v891_v27 = vpop.f32.mrf.mxu1  ;;  %v683_v35 = vadd.f32 %v889_v31, %v643_v30 }
 0x110   :  { %v909_v32 = vpop.f32.mrf.mxu0 }
 0x111   :  { %v931_v33 = vpop.f32.mrf.mxu1 }
 0x112   :  { %v910_v34 = vpop.f32.mrf.mxu0 }
 0x113   :  { %v911_v36 = vadd.f32 %v910_v34, %v909_v32  ;;  %v932_v37 = vpop.f32.mrf.mxu1 }
 0x114   :  { %v912_v38 = vpop.f32.mrf.mxu0  ;;  %v933_v40 = vadd.f32 %v932_v37, %v931_v33 }
 0x115   :  { %v723_v39 = vadd.f32 %v911_v36, %v683_v35  ;;  %v934_v41 = vpop.f32.mrf.mxu1 }
 0x116   :  { %v913_v42 = vpop.f32.mrf.mxu0 }
 0x117   :  { %v763_v43 = vadd.f32 %v933_v40, %v723_v39  ;;  %v935_v44 = vpop.f32.mrf.mxu1 }
 0x119   :  { %768 = vst [vmem:[#allocation5] sm:$0x3] %v763_v43 }
 0x11a   :  { %1038 = shalt.err (!%p1035_p9)
}
 0x11b   :  { %778 = dma.vmem_to_hbm [thread:$0]  %s776_s22, 32, %s1104_s3, [#allocation4]  }
 0x11c   :  { %1049 = dma.done.wait [#allocation4], 32  }
 0x11d   :  { %1050 = vsyncadd [#allocation4], 4294967264 }
 0x11e   :  { %782 = vsyncpa [#allocation3], 1 }
 0x11f   :  { %783 = vsyncpa [#allocation4], 1 }

</bundles_post_ra>
